<compile_context>
chip_gen: v6e
topology: v6e:2x2x1
jax: 0.10.0
libtpu: 0.0.40
codegen_flags: <defaults>
</compile_context>

<pallas_src>
import functools

import jax
import jax.numpy as jnp
from jax.experimental import pallas as pl
from jax.experimental.pallas import tpu as pltpu

BN_EPS = 1e-5


def attentive_transformer_kernel(x_ref, wt_ref, b_ref, gamma_ref, beta_ref,
                                 prior_ref, out_ref,
                                 sum_ref, sumsq_ref, scale_ref, shift_ref,
                                 *, valid_h, inv_batch):
    phase = pl.program_id(0)          # 0: batch-stat accumulation, 1: normalize+softmax
    tile = pl.program_id(1)           # batch tile index
    last_tile = pl.num_programs(1) - 1

    # ---- Linear: bf16 operands on the MXU, f32 accumulation, f32 bias add ----
    y = jnp.dot(x_ref[...], wt_ref[...],
                preferred_element_type=jnp.float32) + b_ref[...]

    @pl.when(phase == 0)
    def _accumulate_stats():
        @pl.when(tile == 0)
        def _init():
            sum_ref[...] = jnp.zeros_like(sum_ref)
            sumsq_ref[...] = jnp.zeros_like(sumsq_ref)

        sum_ref[...] += jnp.sum(y, axis=0, keepdims=True)
        sumsq_ref[...] += jnp.sum(y * y, axis=0, keepdims=True)

        @pl.when(tile == last_tile)
        def _finalize():
            # Biased (training-mode) variance from E[y^2] - E[y]^2, fold the BN
            # affine into scale/shift so phase 1 is a single mul+add per element.
            mean = sum_ref[...] * inv_batch
            var = jnp.maximum(sumsq_ref[...] * inv_batch - mean * mean, 0.0)
            s = gamma_ref[...] * jax.lax.rsqrt(var + BN_EPS)
            scale_ref[...] = s
            shift_ref[...] = beta_ref[...] - mean * s

        # Keep phase-0 output writeback deterministic (overwritten in phase 1).
        out_ref[...] = jnp.zeros_like(out_ref)

    @pl.when(phase == 1)
    def _normalize_and_softmax():
        z = (y * scale_ref[...] + shift_ref[...]) * prior_ref[...]
        # Mask the lane padding (H was padded up to a multiple of 128).
        lane = jax.lax.broadcasted_iota(jnp.int32, z.shape, 1)
        z = jnp.where(lane < valid_h, z, -1e30)

        z_max = jnp.max(z, axis=-1, keepdims=True)
        e = jnp.exp(z - z_max)
        denom = jnp.sum(e, axis=-1, keepdims=True)
        inv = pl.reciprocal(denom, approx=True)     # EUP vrcp (otherwise idle slot)
        inv = inv * (2.0 - denom * inv)             # one Newton step -> ~f32 exact
        out_ref[...] = (e * inv).astype(out_ref.dtype)


def attentive_transformer(x, prior, w_t, b, gamma, beta, *, block_b=256):
    """x: (B, D_in) f32, prior: (B, H) f32, w_t: (D_in, H) pre-transposed weight,
    b/gamma/beta: (H,). Returns softmax mask of shape (B, H), f32."""
    B, D_in = x.shape
    H = w_t.shape[1]
    assert prior.shape == (B, H)

    Hp = ((H + 127) // 128) * 128          # lane-dense feature dim
    tb = min(block_b, B)                   # batch tile
    # TODO(synk): support B % tb != 0 via row masking of the batch-stat accumulation.
    assert B % tb == 0, "batch must be divisible by the batch tile"
    n_tiles = B // tb

    # Layout / dtype plumbing (constant-folds under jit; weight already transposed).
    x_bf = x.astype(jnp.bfloat16)
    wt_p = jnp.pad(w_t, ((0, 0), (0, Hp - H))).astype(jnp.bfloat16)
    b_p = jnp.pad(b, (0, Hp - H)).reshape(1, Hp).astype(jnp.float32)
    g_p = jnp.pad(gamma, (0, Hp - H), constant_values=1.0).reshape(1, Hp).astype(jnp.float32)
    be_p = jnp.pad(beta, (0, Hp - H)).reshape(1, Hp).astype(jnp.float32)
    prior_p = jnp.pad(prior, ((0, 0), (0, Hp - H))).astype(jnp.float32)

    kernel = functools.partial(attentive_transformer_kernel,
                               valid_h=H, inv_batch=1.0 / B)

    out_p = pl.pallas_call(
        kernel,
        out_shape=jax.ShapeDtypeStruct((B, Hp), jnp.float32),
        grid_spec=pltpu.PrefetchScalarGridSpec(
            num_scalar_prefetch=0,
            grid=(2, n_tiles),                                   # (phase, batch tile)
            in_specs=[
                pl.BlockSpec((tb, D_in), lambda p, i: (i, 0)),   # x (bf16)
                pl.BlockSpec((D_in, Hp), lambda p, i: (0, 0)),   # W^T (bf16)
                pl.BlockSpec((1, Hp), lambda p, i: (0, 0)),      # bias
                pl.BlockSpec((1, Hp), lambda p, i: (0, 0)),      # gamma
                pl.BlockSpec((1, Hp), lambda p, i: (0, 0)),      # beta
                pl.BlockSpec((tb, Hp), lambda p, i: (i, 0)),     # prior
            ],
            out_specs=pl.BlockSpec((tb, Hp), lambda p, i: (i, 0)),
            scratch_shapes=[
                pltpu.VMEM((1, Hp), jnp.float32),   # sum(y)      over full batch
                pltpu.VMEM((1, Hp), jnp.float32),   # sum(y*y)    over full batch
                pltpu.VMEM((1, Hp), jnp.float32),   # folded BN scale
                pltpu.VMEM((1, Hp), jnp.float32),   # folded BN shift
            ],
        ),
        compiler_params=pltpu.CompilerParams(
            # Both axes carry state (scratch accumulation / phase dependency).
            dimension_semantics=("arbitrary", "arbitrary"),
        ),
    )(x_bf, wt_p, b_p, g_p, be_p, prior_p)

    return out_p[:, :H]


def reference(x, prior, w, b, gamma, beta):
    y = x @ w.T + b
    mean = jnp.mean(y, axis=0, keepdims=True)
    var = jnp.mean((y - mean) ** 2, axis=0, keepdims=True)
    y = (y - mean) / jnp.sqrt(var + BN_EPS) * gamma + beta
    return jax.nn.softmax(y * prior, axis=-1)


if __name__ == "__main__":
    B, D_IN, H = 256, 16, 32
    key = jax.random.PRNGKey(0)
    kx, kp, kw, kb, kg, kbe = jax.random.split(key, 6)

    x = jax.random.normal(kx, (B, D_IN), dtype=jnp.float32)
    prior = jax.random.uniform(kp, (B, H), dtype=jnp.float32)

    # Deterministic param init (Linear: uniform(-1/sqrt(D_in), 1/sqrt(D_in));
    # BatchNorm: gamma=1, beta=0 — perturbed slightly to exercise the affine path).
    bound = 1.0 / jnp.sqrt(jnp.float32(D_IN))
    w = jax.random.uniform(kw, (H, D_IN), minval=-bound, maxval=bound, dtype=jnp.float32)
    b = jax.random.uniform(kb, (H,), minval=-bound, maxval=bound, dtype=jnp.float32)
    gamma = jnp.ones((H,), jnp.float32) + 0.1 * jax.random.normal(kg, (H,), dtype=jnp.float32)
    beta = 0.1 * jax.random.normal(kbe, (H,), dtype=jnp.float32)

    w_t = w.T  # weight kept pre-transposed (D_in, H); out of the per-call hot path

    out = attentive_transformer(x, prior, w_t, b, gamma, beta, block_b=64)
    out = jax.block_until_ready(out)
    assert out.shape == (B, H)

    # Tight check vs a reference that applies the same bf16 rounding to the matmul
    # operands (the only intentional precision difference in the kernel).
    ref_bf = reference(x.astype(jnp.bfloat16).astype(jnp.float32), prior,
                       w.astype(jnp.bfloat16).astype(jnp.float32), b, gamma, beta)
    assert jnp.allclose(out, ref_bf, atol=1e-4, rtol=1e-4), "mismatch vs bf16-operand reference"

    # Sanity check vs the pure-f32 reference (difference = bf16 operand rounding).
    ref_f32 = reference(x, prior, w, b, gamma, beta)
    assert jnp.allclose(out, ref_f32, atol=2e-2), "mismatch vs f32 reference"

    # Rows must still sum to 1 (approx reciprocal + Newton step keeps this tight).
    assert jnp.allclose(jnp.sum(out, axis=-1), 1.0, atol=1e-5)

    print("KERNEL_OK")
</pallas_src>

<mosaic_0001>
module attributes {stable_mosaic.version = 11 : i64} {
  func.func @attentive_transformer_kernel(%arg0: i32, %arg1: i32, %arg2: memref<64x16xbf16, #tpu.memory_space<vmem>>, %arg3: memref<16x128xbf16, #tpu.memory_space<vmem>>, %arg4: memref<1x128xf32, #tpu.memory_space<vmem>>, %arg5: memref<1x128xf32, #tpu.memory_space<vmem>>, %arg6: memref<1x128xf32, #tpu.memory_space<vmem>>, %arg7: memref<64x128xf32, #tpu.memory_space<vmem>>, %arg8: memref<64x128xf32, #tpu.memory_space<vmem>>, %arg9: memref<1x128xf32, #tpu.memory_space<vmem>>, %arg10: memref<1x128xf32, #tpu.memory_space<vmem>>, %arg11: memref<1x128xf32, #tpu.memory_space<vmem>>, %arg12: memref<1x128xf32, #tpu.memory_space<vmem>>) attributes {dimension_semantics = [#tpu.dimension_semantics<arbitrary>, #tpu.dimension_semantics<arbitrary>], iteration_bounds = array<i64: 2, 4>, scalar_prefetch = 0 : i64, scratch_operands = 4 : i64, tpu.core_type = #tpu.core_type<tc>, window_params = [{transform_indices = @transform_0, window_bounds = array<i64: 64, 16>}, {pipeline_mode = #tpu.pipeline_mode<synchronous>, transform_indices = @transform_1, window_bounds = array<i64: 16, 128>}, {pipeline_mode = #tpu.pipeline_mode<synchronous>, transform_indices = @transform_2, window_bounds = array<i64: 1, 128>}, {pipeline_mode = #tpu.pipeline_mode<synchronous>, transform_indices = @transform_3, window_bounds = array<i64: 1, 128>}, {pipeline_mode = #tpu.pipeline_mode<synchronous>, transform_indices = @transform_4, window_bounds = array<i64: 1, 128>}, {transform_indices = @transform_5, window_bounds = array<i64: 64, 128>}, {transform_indices = @transform_6, window_bounds = array<i64: 64, 128>}]} {
    %c0 = arith.constant 0 : index
    %c0_0 = arith.constant 0 : index
    %0 = vector.load %arg2[%c0, %c0_0] : memref<64x16xbf16, #tpu.memory_space<vmem>>, vector<64x16xbf16>
    %c0_1 = arith.constant 0 : index
    %c0_2 = arith.constant 0 : index
    %1 = vector.load %arg3[%c0_1, %c0_2] : memref<16x128xbf16, #tpu.memory_space<vmem>>, vector<16x128xbf16>
    %cst = arith.constant dense<0.000000e+00> : vector<64x128xf32>
    %2 = tpu.matmul %0, %1, %cst {dimension_numbers = #tpu.dot_dimension_numbers<[1], [0], [0], [1], [0, 0, 1, 1], [], []>} : vector<64x16xbf16>, vector<16x128xbf16>, vector<64x128xf32> -> vector<64x128xf32>
    %c0_3 = arith.constant 0 : index
    %c0_4 = arith.constant 0 : index
    %3 = vector.load %arg4[%c0_3, %c0_4] : memref<1x128xf32, #tpu.memory_space<vmem>>, vector<1x128xf32>
    %4 = vector.broadcast %3 : vector<1x128xf32> to vector<64x128xf32>
    %5 = arith.addf %2, %4 : vector<64x128xf32>
    %c0_i32 = arith.constant 0 : i32
    %6 = arith.cmpi eq, %arg0, %c0_i32 : i32
    %7 = arith.extui %6 : i1 to i32
    %c0_i32_5 = arith.constant 0 : i32
    %8 = arith.cmpi ne, %7, %c0_i32_5 : i32
    scf.if %8 {
      %c0_i32_7 = arith.constant 0 : i32
      %12 = arith.cmpi eq, %arg1, %c0_i32_7 : i32
      %13 = arith.extui %12 : i1 to i32
      %c0_i32_8 = arith.constant 0 : i32
      %14 = arith.cmpi ne, %13, %c0_i32_8 : i32
      scf.if %14 {
        %cst_23 = arith.constant 0.000000e+00 : f32
        %31 = vector.broadcast %cst_23 : f32 to vector<1x128xf32>
        %c0_24 = arith.constant 0 : index
        %c0_25 = arith.constant 0 : index
        %32 = vector.load %arg9[%c0_24, %c0_25] : memref<1x128xf32, #tpu.memory_space<vmem>>, vector<1x128xf32>
        tpu.vector_store %arg9[%c0_24, %c0_25], %31 {strides = array<i32>} : memref<1x128xf32, #tpu.memory_space<vmem>>, vector<1x128xf32>,
        %cst_26 = arith.constant 0.000000e+00 : f32
        %33 = vector.broadcast %cst_26 : f32 to vector<1x128xf32>
        %c0_27 = arith.constant 0 : index
        %c0_28 = arith.constant 0 : index
        %34 = vector.load %arg10[%c0_27, %c0_28] : memref<1x128xf32, #tpu.memory_space<vmem>>, vector<1x128xf32>
        tpu.vector_store %arg10[%c0_27, %c0_28], %33 {strides = array<i32>} : memref<1x128xf32, #tpu.memory_space<vmem>>, vector<1x128xf32>,
      } else {
      }
      %c0_9 = arith.constant 0 : index
      %c0_10 = arith.constant 0 : index
      %15 = vector.load %arg9[%c0_9, %c0_10] : memref<1x128xf32, #tpu.memory_space<vmem>>, vector<1x128xf32>
      %cst_11 = arith.constant dense<0.000000e+00> : vector<128xf32>
      %16 = vector.multi_reduction <add>, %5, %cst_11 [0] : vector<64x128xf32> to vector<128xf32>
      %17 = vector.shape_cast %16 : vector<128xf32> to vector<1x128xf32>
      %18 = arith.addf %15, %17 : vector<1x128xf32>
      %c0_12 = arith.constant 0 : index
      %c0_13 = arith.constant 0 : index
      %19 = vector.load %arg9[%c0_12, %c0_13] : memref<1x128xf32, #tpu.memory_space<vmem>>, vector<1x128xf32>
      tpu.vector_store %arg9[%c0_12, %c0_13], %18 {strides = array<i32>} : memref<1x128xf32, #tpu.memory_space<vmem>>, vector<1x128xf32>,
      %c0_14 = arith.constant 0 : index
      %c0_15 = arith.constant 0 : index
      %20 = vector.load %arg10[%c0_14, %c0_15] : memref<1x128xf32, #tpu.memory_space<vmem>>, vector<1x128xf32>
      %21 = arith.mulf %5, %5 : vector<64x128xf32>
      %cst_16 = arith.constant dense<0.000000e+00> : vector<128xf32>
      %22 = vector.multi_reduction <add>, %21, %cst_16 [0] : vector<64x128xf32> to vector<128xf32>
      %23 = vector.shape_cast %22 : vector<128xf32> to vector<1x128xf32>
      %24 = arith.addf %20, %23 : vector<1x128xf32>
      %c0_17 = arith.constant 0 : index
      %c0_18 = arith.constant 0 : index
      %25 = vector.load %arg10[%c0_17, %c0_18] : memref<1x128xf32, #tpu.memory_space<vmem>>, vector<1x128xf32>
      tpu.vector_store %arg10[%c0_17, %c0_18], %24 {strides = array<i32>} : memref<1x128xf32, #tpu.memory_space<vmem>>, vector<1x128xf32>,
      %c3_i32 = arith.constant 3 : i32
      %26 = arith.cmpi eq, %arg1, %c3_i32 : i32
      %27 = arith.extui %26 : i1 to i32
      %c0_i32_19 = arith.constant 0 : i32
      %28 = arith.cmpi ne, %27, %c0_i32_19 : i32
      scf.if %28 {
        %c0_23 = arith.constant 0 : index
        %c0_24 = arith.constant 0 : index
        %31 = vector.load %arg9[%c0_23, %c0_24] : memref<1x128xf32, #tpu.memory_space<vmem>>, vector<1x128xf32>
        %cst_25 = arith.constant 3.906250e-03 : f32
        %32 = vector.broadcast %cst_25 : f32 to vector<1x128xf32>
        %33 = arith.mulf %31, %32 : vector<1x128xf32>
        %c0_26 = arith.constant 0 : index
        %c0_27 = arith.constant 0 : index
        %34 = vector.load %arg10[%c0_26, %c0_27] : memref<1x128xf32, #tpu.memory_space<vmem>>, vector<1x128xf32>
        %cst_28 = arith.constant 3.906250e-03 : f32
        %35 = vector.broadcast %cst_28 : f32 to vector<1x128xf32>
        %36 = arith.mulf %34, %35 : vector<1x128xf32>
        %37 = arith.mulf %33, %33 : vector<1x128xf32>
        %38 = arith.subf %36, %37 : vector<1x128xf32>
        %cst_29 = arith.constant 0.000000e+00 : f32
        %39 = vector.broadcast %cst_29 : f32 to vector<1x128xf32>
        %40 = arith.maximumf %38, %39 : vector<1x128xf32>
        %c0_30 = arith.constant 0 : index
        %c0_31 = arith.constant 0 : index
        %41 = vector.load %arg5[%c0_30, %c0_31] : memref<1x128xf32, #tpu.memory_space<vmem>>, vector<1x128xf32>
        %cst_32 = arith.constant 9.99999974E-6 : f32
        %42 = vector.broadcast %cst_32 : f32 to vector<1x128xf32>
        %43 = arith.addf %40, %42 : vector<1x128xf32>
        %44 = math.rsqrt %43 : vector<1x128xf32>
        %45 = arith.mulf %41, %44 : vector<1x128xf32>
        %c0_33 = arith.constant 0 : index
        %c0_34 = arith.constant 0 : index
        %46 = vector.load %arg11[%c0_33, %c0_34] : memref<1x128xf32, #tpu.memory_space<vmem>>, vector<1x128xf32>
        tpu.vector_store %arg11[%c0_33, %c0_34], %45 {strides = array<i32>} : memref<1x128xf32, #tpu.memory_space<vmem>>, vector<1x128xf32>,
        %c0_35 = arith.constant 0 : index
        %c0_36 = arith.constant 0 : index
        %47 = vector.load %arg6[%c0_35, %c0_36] : memref<1x128xf32, #tpu.memory_space<vmem>>, vector<1x128xf32>
        %48 = arith.mulf %33, %45 : vector<1x128xf32>
        %49 = arith.subf %47, %48 : vector<1x128xf32>
        %c0_37 = arith.constant 0 : index
        %c0_38 = arith.constant 0 : index
        %50 = vector.load %arg12[%c0_37, %c0_38] : memref<1x128xf32, #tpu.memory_space<vmem>>, vector<1x128xf32>
        tpu.vector_store %arg12[%c0_37, %c0_38], %49 {strides = array<i32>} : memref<1x128xf32, #tpu.memory_space<vmem>>, vector<1x128xf32>,
      } else {
      }
      %cst_20 = arith.constant 0.000000e+00 : f32
      %29 = vector.broadcast %cst_20 : f32 to vector<64x128xf32>
      %c0_21 = arith.constant 0 : index
      %c0_22 = arith.constant 0 : index
      %30 = vector.load %arg8[%c0_21, %c0_22] : memref<64x128xf32, #tpu.memory_space<vmem>>, vector<64x128xf32>
      tpu.vector_store %arg8[%c0_21, %c0_22], %29 {strides = array<i32>} : memref<64x128xf32, #tpu.memory_space<vmem>>, vector<64x128xf32>,
    } else {
    }
    %c1_i32 = arith.constant 1 : i32
    %9 = arith.cmpi eq, %arg0, %c1_i32 : i32
    %10 = arith.extui %9 : i1 to i32
    %c0_i32_6 = arith.constant 0 : i32
    %11 = arith.cmpi ne, %10, %c0_i32_6 : i32
    scf.if %11 {
      %c0_7 = arith.constant 0 : index
      %c0_8 = arith.constant 0 : index
      %12 = vector.load %arg11[%c0_7, %c0_8] : memref<1x128xf32, #tpu.memory_space<vmem>>, vector<1x128xf32>
      %13 = vector.broadcast %12 : vector<1x128xf32> to vector<64x128xf32>
      %14 = arith.mulf %5, %13 : vector<64x128xf32>
      %c0_9 = arith.constant 0 : index
      %c0_10 = arith.constant 0 : index
      %15 = vector.load %arg12[%c0_9, %c0_10] : memref<1x128xf32, #tpu.memory_space<vmem>>, vector<1x128xf32>
      %16 = vector.broadcast %15 : vector<1x128xf32> to vector<64x128xf32>
      %17 = arith.addf %14, %16 : vector<64x128xf32>
      %c0_11 = arith.constant 0 : index
      %c0_12 = arith.constant 0 : index
      %18 = vector.load %arg7[%c0_11, %c0_12] : memref<64x128xf32, #tpu.memory_space<vmem>>, vector<64x128xf32>
      %19 = arith.mulf %17, %18 : vector<64x128xf32>
      %20 = tpu.iota {dimensions = array<i32: 1>} : vector<64x128xi32>
      %c32_i32 = arith.constant 32 : i32
      %21 = vector.broadcast %c32_i32 : i32 to vector<64x128xi32>
      %22 = arith.cmpi slt, %20, %21 : vector<64x128xi32>
      %cst_13 = arith.constant -1.000000e+30 : f32
      %23 = vector.broadcast %cst_13 : f32 to vector<64x128xf32>
      %24 = arith.select %22, %19, %23 : vector<64x128xi1>, vector<64x128xf32>
      %cst_14 = arith.constant dense<0xFF800000> : vector<64xf32>
      %25 = vector.multi_reduction <maximumf>, %24, %cst_14 [1] : vector<64x128xf32> to vector<64xf32>
      %26 = vector.shape_cast %25 : vector<64xf32> to vector<64x1xf32>
      %27 = vector.broadcast %26 : vector<64x1xf32> to vector<64x128xf32>
      %28 = arith.subf %24, %27 : vector<64x128xf32>
      %29 = math.exp %28 : vector<64x128xf32>
      %cst_15 = arith.constant dense<0.000000e+00> : vector<64xf32>
      %30 = vector.multi_reduction <add>, %29, %cst_15 [1] : vector<64x128xf32> to vector<64xf32>
      %31 = vector.shape_cast %30 : vector<64xf32> to vector<64x1xf32>
      %32 = tpu.reciprocal %31 {approx = true} : vector<64x1xf32> -> vector<64x1xf32>
      %33 = arith.mulf %31, %32 : vector<64x1xf32>
      %cst_16 = arith.constant 2.000000e+00 : f32
      %34 = vector.broadcast %cst_16 : f32 to vector<64x1xf32>
      %35 = arith.subf %34, %33 : vector<64x1xf32>
      %36 = arith.mulf %32, %35 : vector<64x1xf32>
      %37 = vector.broadcast %36 : vector<64x1xf32> to vector<64x128xf32>
      %38 = arith.mulf %29, %37 : vector<64x128xf32>
      %c0_17 = arith.constant 0 : index
      %c0_18 = arith.constant 0 : index
      %39 = vector.load %arg8[%c0_17, %c0_18] : memref<64x128xf32, #tpu.memory_space<vmem>>, vector<64x128xf32>
      tpu.vector_store %arg8[%c0_17, %c0_18], %38 {strides = array<i32>} : memref<64x128xf32, #tpu.memory_space<vmem>>, vector<64x128xf32>,
    } else {
    }
    return
  }
  func.func @transform_0(%arg0: i32, %arg1: i32) -> (i32, i32) {
    %c0_i32 = arith.constant 0 : i32
    %c0_i32_0 = arith.constant 0 : i32
    return %arg1, %c0_i32 : i32, i32
  }
  func.func @transform_1(%arg0: i32, %arg1: i32) -> (i32, i32) {
    %c0_i32 = arith.constant 0 : i32
    %c0_i32_0 = arith.constant 0 : i32
    %c0_i32_1 = arith.constant 0 : i32
    return %c0_i32, %c0_i32_0 : i32, i32
  }
  func.func @transform_2(%arg0: i32, %arg1: i32) -> (i32, i32) {
    %c0_i32 = arith.constant 0 : i32
    %c0_i32_0 = arith.constant 0 : i32
    %c0_i32_1 = arith.constant 0 : i32
    return %c0_i32, %c0_i32_0 : i32, i32
  }
  func.func @transform_3(%arg0: i32, %arg1: i32) -> (i32, i32) {
    %c0_i32 = arith.constant 0 : i32
    %c0_i32_0 = arith.constant 0 : i32
    %c0_i32_1 = arith.constant 0 : i32
    return %c0_i32, %c0_i32_0 : i32, i32
  }
  func.func @transform_4(%arg0: i32, %arg1: i32) -> (i32, i32) {
    %c0_i32 = arith.constant 0 : i32
    %c0_i32_0 = arith.constant 0 : i32
    %c0_i32_1 = arith.constant 0 : i32
    return %c0_i32, %c0_i32_0 : i32, i32
  }
  func.func @transform_5(%arg0: i32, %arg1: i32) -> (i32, i32) {
    %c0_i32 = arith.constant 0 : i32
    %c0_i32_0 = arith.constant 0 : i32
    return %arg1, %c0_i32 : i32, i32
  }
  func.func @transform_6(%arg0: i32, %arg1: i32) -> (i32, i32) {
    %c0_i32 = arith.constant 0 : i32
    %c0_i32_0 = arith.constant 0 : i32
    return %arg1, %c0_i32 : i32, i32
  }
}

</mosaic_0001>

<bundles_post_ra>
// kernel: tpu_custom_call.1
= control target key start
LH: loop header
LB: loop body
LE: loop exit
PB: predicated region body
PF: predicated region fallthrough
CT: control target
= control target key end

     0   :  { %11 = vsyncpa [#allocation7], 0  ;;  %s1412_s0 = inlined_call_operand.vmem [shape: bf16[256,16], index: 0, kind: input, shape index: {}]   ;;  %s1413_s1 = inlined_call_operand.vmem [shape: bf16[16,128], index: 1, kind: input, shape index: {}]   ;;  %s1414_s2 = inlined_call_operand.vmem [shape: f32[1,128], index: 2, kind: input, shape index: {}]   ;;  %s1415_s3 = inlined_call_operand.vmem [shape: f32[1,128], index: 3, kind: input, shape index: {}]   ;;  %s1416_s4 = inlined_call_operand.vmem [shape: f32[1,128], index: 4, kind: input, shape index: {}]   ;;  %s1417_s5 = inlined_call_operand.hbm [shape: f32[256,128], index: 5, kind: input, shape index: {}]   ;;  %s1418_s6 = inlined_call_operand.hbm [shape: f32[256,128], index: 6, kind: output, shape index: {}]  }
   0x1   :  { %13 = vsyncpa [#allocation7 + $0x1], 0 }
   0x2   :  { %14 = vsyncpa [#allocation8], 0 }
   0x3   :  { %16 = vsyncpa [#allocation8 + $0x1], 0  ;;  %s1125_s21 = smov 0   ;;  %s1127_s22 = smov 0  }
   0x4   :  { %s1129_s23 = smov 0   ;;  %s1131_s24 = smov 0  }
   0x5   :  { %s1133_s25 = smov 0   ;;  %s1135_s26 = smov 0  }
   0x6   :  { %s1137_s27 = smov 0   ;;  %s1139_s28 = smov 0  }
   0x7 LB: > { %1421 = sst [smem:[#allocation12_spill]] %s1076_s27  ;;  %s781_s29 = sadd.s32 4294967295, %s1080_s28   ;;  %s1080_s28 = sphi %s1139_s28, %s22_s28   ;;  %s1076_s27 = sphi %s1137_s27, %s1431_s27   ;;  %s1072_s26 = sphi %s1135_s26, %s1436_s26   ;;  %s1068_s25 = sphi %s1133_s25, %s1429_s25   ;;  %s1064_s24 = sphi %s1131_s24, %s1435_s24   ;;  %s1060_s23 = sphi %s1129_s23, %s1434_s23   ;;  %s1056_s22 = sphi %s1127_s22, %s1433_s22   ;;  %s1052_s21 = sphi %s1125_s21, %s1432_s21  }
   0x8   : > { %s782_s30 = sadd.s32 4294967294, %s1080_s28   ;;  %s31_s7 = sadd.s32 1, %s1072_s26 }
   0x9   : > { %s34_s8 = sadd.s32 1, %s1076_s27  ;;  %p32_p0 = scmp.ge.s32.totalorder %s31_s7, 4 }
   0xa   : > { %s151_s9 = sadd.s32 1, %s1060_s23  ;;  %p158_p1 = scmp.ne.s32.totalorder %s1060_s23, %s1056_s22 }
   0xb   : > { %p159_p2 = scmp.eq.s32.totalorder %s1080_s28, 0  ;;  %s1438_s7 = smov (%p32_p0, %s31_s7), 0 }
   0xc   : > { %1422 = sst [smem:[#allocation13_spill]] %s1438_s7  ;;  %s1440_s8 = smov (!%p32_p0, %s34_s8), %s1076_s27 }
   0xd   : > { %s148_s10 = ssub.s32 %s1072_s26, %s1438_s7  ;;  %p1181_p3 = por %p159_p2, %p158_p1 }
   0xe   : > { %p36_p4 = scmp.ge.s32.totalorder %s1440_s8, 2  ;;  %p149_p5 = scmp.eq.s32.totalorder %s148_s10, 0 }
   0xf   : > { %p164_p6 = scmp.ne.s32.totalorder %s1056_s22, %s1052_s21  ;;  %p165_p7 = scmp.eq.s32.totalorder %s781_s29, 0 }
  0x10   : > { %s1442_s8 = smov (%p36_p4, %s1440_s8), 0  ;;  %p188_p9 = scmp.eq.s32.totalorder %s781_s29, 7 }
  0x11   : > { %1424 = sst [smem:[#allocation14_spill]] %s1442_s8  ;;  %p1192_p8 = por %p165_p7, %p164_p6 }
  0x12   : > { %s1190_s12 = scalar_select %p149_p5, %s1060_s23, %s151_s9  }
  0x13   : > { %p194_p10 = scmp.eq.s32.totalorder %s782_s30, 7  ;;  %p1199_p11 = por %p188_p9, %p158_p1 }
  0x14   : > { %p845_p12 = scmp.lt.s32.totalorder %s1080_s28, 8  ;;  %s235_s16 = sand.u32 1, %s1060_s23  }
  0x15   : > { %p1204_p13 = por %p194_p10, %p164_p6  ;;  %s785_s17 = sshll.u32 %s235_s16, 6 }
  0x16   : > { %s814_s18 = sshll.u32 %s1072_s26, 10  ;;  %s239_s10 = scalar_lea.vmem [#allocation6], %s785_s17 }
  0x17   : > { %s245_s9 = scalar_lea.hbm %s1417_s5, %s814_s18  ;;  %s246_s29 = sshll.u32 %s239_s10, 4  ;;  %s247_s29 = int_to_ptr.vmem [resolvable:$true] %s246_s29 }
  0x18   : > { %p1215_p0 = pnand %p845_p12, %p1181_p3  ;;  %p788_p1 = scmp.ge.s32.totalorder %s1080_s28, 1 }
  0x19   : > { %s236_s8 = scalar_lea.sflag [#allocation7], %s235_s16  ;;  %s969_s7 = scalar_lea.vmem %s247_s29, 1024 }
  0x1a   : > { %p958_p2 = pneg %p1215_p0  ;;  %p970_p4 = scmp.ne.s32.totalorder %s247_s29, %s969_s7 }
  0x1b   : > { %s1082_s27 = smov [#allocation6]  }
  0x1c   : > { %p972_p5 = pnand %p970_p4, %p958_p2  ;;  %s974_s19 = sshll.u32 %s1082_s27, 4  ;;  %s975_s19 = int_to_ptr.vmem [resolvable:$false] %s974_s19 }
  0x1d   : > { %s976_s17 = scalar_lea.vmem %s975_s19, 2048  ;;  %p977_p7 = scmp.lt.s32.totalorder %s247_s29, %s975_s19 }
  0x1e   : > { %p973_p6 = pneg %p972_p5  ;;  %p978_p9 = scmp.lt.s32.totalorder %s976_s17, %s969_s7 }
  0x20   : > { %p979_p10 = por %p978_p9, %p977_p7 }
  0x22   : > { %p980_p3 = pnand %p979_p10, %p973_p6 }
  0x24   : > { %983 = shalt.err (!%p980_p3)
}
  0x25   : > { %s1083_s11 = smov 128   ;;  %s1084_s16 = smov 8  }
  0x26   : > { %840 = dma.hbm_to_vmem [thread:$0]  (!%p1215_p0), %s245_s9, 1024, %s247_s29, %s236_s8, %s1083_s11, %s1083_s11, %s1084_s16  }
  0x27   : > { %p254_p12 = scmp.lt.s32.totalorder %s1080_s28, 9 }
  0x29   : > { %p255_p2 = pnand %p788_p1, %p254_p12 }
  0x2a   : > { %s1228_s27 = sand.u32 (!%p255_p2), 1, %s1056_s22  }
  0x2b   : > { %258 = sbr.rel (%p255_p2) target bundleno = 708 (0x2c4), region = 44  ;;  %s789_s7 = sshll.u32 (!%p255_p2), %s1228_s27, 6 }
  0x2c   : > { %s261_s18 = scalar_lea.sflag (!%p255_p2), [#allocation7], %s1228_s27  ;;  %s1234_s20 = scalar_lea.vmem (!%p255_p2), [#allocation6], %s789_s7 }
  0x30   : > { %1043 = dma.done.wait (%p1192_p8), %s261_s18, 1024  }
  0x31   : > { %1045 = vsyncadd (%p1192_p8), %s261_s18, 4294966272  ;;  %s791_s8 = sshll.u32 %s1064_s24, 3  ;;  %v917_v0 = vld [vmem:[%s1413_s1] sm:$0xff]   ;;  %vm350_vm0 = vcmask 130048   ;;  %s1268_s16 = scalar_lea.vmem [#allocation9], %s789_s7 }
  0x32   : > { %p299_p0 = scmp.lt.s32.totalorder %s791_s8, 31  ;;  %821 = vmatprep.subr.bf16.mxu0 %v917_v0  ;;  %831 = vmatprep.subr.bf16.mxu1 %v917_v0  ;;  %v793_v5 = vld [vmem:[%s1414_s2] ss:$0 sm:$0xff]  ;;  %p803_p8 = scmp.ne.s32.totalorder %s1068_s25, 0 }
  0x33   : > { %822 = vmatpush3.bf16.msra.mxu0 %v917_v0  ;;  %832 = vmatpush3.bf16.msra.mxu1 %v917_v0  ;;  %p804_p1 = scmp.ne.s32.totalorder (!%p803_p8), %s1064_s24, 0 }
  0x34   : > { %s1444_s8 = smov (!%p299_p0, %s791_s8), 31 }
  0x35   : > { %s792_s9 = sshll.u32 %s1444_s8, 2 }
  0x36   : > { %s302_s30 = scalar_lea.vmem %s1412_s0, %s792_s9 }
  0x37   : > { %v918_v1 = vld [vmem:[%s302_s30] sm:$0xff]   ;;  %v919_v2 = vld [vmem:[%s302_s30 + $0x10] sm:$0xff]   ;;  %v920_v3 = vld [vmem:[%s302_s30 + $0x8] sm:$0xff]  }
  0x38   : > { %823 = vmatprep.mubr.msk.bf16.mxu0 %vm350_vm0, %v918_v1  ;;  %827 = vmatprep.mubr.msk.bf16.mxu1 %vm350_vm0, %v919_v2  ;;  %v921_v4 = vld [vmem:[%s302_s30 + $0x18] sm:$0xff]  }
  0x39   : > { %824 = vmatmul.mubr.msk.bf16.vlgmr.msra.gmra.mxu0 %vm350_vm0, %v920_v3  ;;  %828 = vmatmul.mubr.msk.bf16.vlgmr.msra.gmra.mxu1 %vm350_vm0, %v921_v4 }
  0xf9   : > { %v825_v6 = vpop.f32.mrf.mxu0  ;;  %v829_v7 = vpop.f32.mrf.mxu1 }
  0xfa   : > { %v1250_v8 = vadd.f32 %v825_v6, %v793_v5  ;;  %v1252_v9 = vadd.f32 %v829_v7, %v793_v5 }
  0xfb   : > { %v397_v10 = vpop.f32.mrf.mxu0  ;;  %v413_v11 = vpop.f32.mrf.mxu1 }
  0xfc   : > { %v1254_v12 = vadd.f32 %v793_v5, %v397_v10  ;;  %v1256_v13 = vadd.f32 %v793_v5, %v413_v11  ;;  %431 = sbr.rel (%p803_p8) target bundleno = 336 (0x150), region = 52 }
  0xfd   : > { %v826_v14 = vpop.f32.mrf.mxu0  ;;  %v830_v15 = vpop.f32.mrf.mxu1 }
  0xfe   : > { %v1258_v16 = vadd.f32 %v826_v14, %v793_v5  ;;  %v1260_v17 = vadd.f32 %v830_v15, %v793_v5 }
  0xff   : > { %v400_v18 = vpop.f32.mrf.mxu0  ;;  %v416_v19 = vpop.f32.mrf.mxu1 }
 0x100   : > { %v1262_v20 = vadd.f32 %v793_v5, %v400_v18  ;;  %v1264_v21 = vadd.f32 %v793_v5, %v416_v19 }
 0x101   : > { %435 = sbr.rel (%p804_p1) target bundleno = 264 (0x108), region = 56 }
 0x106   : > { %v1085_v22 = vmov 0.0  }
 0x107   : > { %436 = vst [vmem:[#allocation2] sm:$0x1] %v1085_v22  ;;  %437 = vst [vmem:[#allocation3] sm:$0x1] %v1085_v22 }
 0x108 PF: > { %v439_v23 = vadd.f32 %v1262_v20, %v1254_v12  ;;  %v455_v24 = vmul.f32 %v1254_v12, %v1254_v12  ;;  %v456_v25 = vmul.f32 %v1262_v20, %v1262_v20  ;;  %v457_v26 = vmul.f32 %v1250_v8, %v1250_v8  ;;  %p805_p4 = scmp.ne.s32.totalorder %s1064_s24, 3 }
 0x109   : > { %v458_v28 = vmul.f32 %v1258_v16, %v1258_v16  ;;  %v459_v31 = vmul.f32 %v1256_v13, %v1256_v13  ;;  %v460_v34 = vmul.f32 %v1264_v21, %v1264_v21  ;;  %v461_v37 = vmul.f32 %v1252_v9, %v1252_v9 }
 0x10a   : > { %v440_v27 = vadd.f32 %v439_v23, %v1250_v8  ;;  %v463_v29 = vadd.f32 %v456_v25, %v455_v24  ;;  %v462_v40 = vmul.f32 %v1260_v17, %v1260_v17 }
 0x10c   : > { %v441_v30 = vadd.f32 %v440_v27, %v1258_v16  ;;  %v464_v32 = vadd.f32 %v463_v29, %v457_v26 }
 0x10e   : > { %v442_v33 = vadd.f32 %v441_v30, %v1256_v13  ;;  %v465_v35 = vadd.f32 %v464_v32, %v458_v28  ;;  %v438_v54 = vld [vmem:[#allocation2] sm:$0x1]  ;;  %v454_v57 = vld [vmem:[#allocation3] sm:$0x1] }
 0x110   : > { %v443_v36 = vadd.f32 %v442_v33, %v1264_v21  ;;  %v466_v38 = vadd.f32 %v465_v35, %v459_v31 }
 0x112   : > { %v444_v39 = vadd.f32 %v443_v36, %v1252_v9  ;;  %v467_v41 = vadd.f32 %v466_v38, %v460_v34 }
 0x114   : > { %v445_v42 = vadd.f32 %v444_v39, %v1260_v17  ;;  %v468_v43 = vadd.f32 %v467_v41, %v461_v37 }
 0x116   : > { %v446_v44 = vrot.slane %v445_v42, 4  ;;  %v469_v45 = vadd.f32 %v468_v43, %v462_v40 }
 0x118   : > { %v447_v46 = vadd.f32 %v446_v44, %v445_v42  ;;  %v470_v47 = vrot.slane %v469_v45, 4 }
 0x11a   : > { %v448_v48 = vrot.slane %v447_v46, 2  ;;  %v471_v49 = vadd.f32 %v470_v47, %v469_v45 }
 0x11c   : > { %v449_v50 = vadd.f32 %v448_v48, %v447_v46  ;;  %v472_v51 = vrot.slane %v471_v49, 2 }
 0x11e   : > { %v450_v52 = vrot.slane %v449_v50, 1  ;;  %v473_v53 = vadd.f32 %v472_v51, %v471_v49 }
 0x120   : > { %v451_v55 = vadd.f32 %v450_v52, %v449_v50  ;;  %v474_v56 = vrot.slane %v473_v53, 1 }
 0x122   : > { %v452_v58 = vadd.f32 %v451_v55, %v438_v54  ;;  %v475_v59 = vadd.f32 %v474_v56, %v473_v53  ;;  %481 = sbr.rel (%p805_p4) target bundleno = 331 (0x14b), region = 60 }
 0x124   : > { %453 = vst [vmem:[#allocation2] sm:$0x1] %v452_v58  ;;  %v476_v60 = vadd.f32 %v475_v59, %v454_v57 }
 0x126   : > { %477 = vst [vmem:[#allocation3] sm:$0x1] %v476_v60 }
 0x127   : > { %v489_v5 = vld [vmem:[%s1415_s3] sm:$0x1] }
 0x128   : > { %v494_v10 = vld [vmem:[%s1416_s4] sm:$0x1] }
 0x12b   : > { %v482_v61 = vld [vmem:[#allocation2] sm:$0x1] }
 0x12c   : > { %v483_v63 = vmul.f32 0.00390625, %v482_v61 }
 0x12d   : > { %v484_v62 = vld [vmem:[#allocation3] sm:$0x1] }
 0x12e   : > { %v485_v0 = vmul.f32 0.00390625, %v484_v62  ;;  %v486_v1 = vmul.f32 %v483_v63, %v483_v63 }
 0x130   : > { %v487_v2 = vsub.f32 %v485_v0, %v486_v1 }
 0x132   : > { %v488_v3 = vmax.f32 %v487_v2, 0.0 }
 0x134   : > { %v490_v4 = vadd.f32 1e-05, %v488_v3 }
 0x136   : > { %922 = vrsqrt.f32 %v490_v4 }
 0x143   : > { %v923_v6 = vpop.eup %922 }
 0x144   : > { %v492_v7 = vmul.f32 %v923_v6, %v489_v5 }
 0x146   : > { %493 = vst [vmem:[#allocation4] sm:$0x1] %v492_v7  ;;  %v495_v11 = vmul.f32 %v492_v7, %v483_v63 }
 0x148   : > { %v496_v14 = vsub.f32 %v494_v10, %v495_v11 }
 0x14a   : > { %497 = vst [vmem:[#allocation5] sm:$0x1] %v496_v14 }
 0x14b PF: > { %v1086_v15 = vmov 0.0  }
 0x14c   : > { %498 = vst [vmem:[%s1268_s16] sm:$0xff] %v1086_v15  ;;  %499 = vst [vmem:[%s1268_s16 + $0x8] sm:$0xff] %v1086_v15 }
 0x14d   : > { %500 = vst [vmem:[%s1268_s16 + $0x10] sm:$0xff] %v1086_v15  ;;  %501 = vst [vmem:[%s1268_s16 + $0x18] sm:$0xff] %v1086_v15 }
 0x14e   : > { %502 = vst [vmem:[%s1268_s16 + $0x20] sm:$0xff] %v1086_v15  ;;  %503 = vst [vmem:[%s1268_s16 + $0x28] sm:$0xff] %v1086_v15 }
 0x14f   : > { %504 = vst [vmem:[%s1268_s16 + $0x30] sm:$0xff] %v1086_v15  ;;  %505 = vst [vmem:[%s1268_s16 + $0x38] sm:$0xff] %v1086_v15 }
 0x150 PF: > { %p806_p5 = scmp.ne.s32.totalorder %s1068_s25, 1 }
 0x152   : > { %509 = sbr.rel (%p806_p5) target bundleno = 684 (0x2ac), region = 64 }
 0x157   : > { %v807_v18 = vld [vmem:[#allocation4] ss:$0 sm:$0xff]  ;;  %v808_v19 = vld [vmem:[#allocation5] ss:$0 sm:$0xff]  ;;  %v556_v22 = vlaneseq  ;;  %v540_v24 = vld [vmem:[%s1234_s20] sm:$0xff] }
 0x158   : > { %v517_v23 = vmul.f32 %v807_v18, %v1254_v12  ;;  %v519_v25 = vmul.f32 %v807_v18, %v1250_v8  ;;  %v518_v26 = vmul.f32 %v807_v18, %v1262_v20  ;;  %v520_v27 = vmul.f32 %v807_v18, %v1258_v16  ;;  %v542_v29 = vld [vmem:[%s1234_s20 + $0x10] sm:$0xff]  ;;  %v541_v30 = vld [vmem:[%s1234_s20 + $0x8] sm:$0xff]  ;;  %v543_v31 = vld [vmem:[%s1234_s20 + $0x18] sm:$0xff] }
 0x159   : > { %v557_v28 = vand.u32 127, %v556_v22  ;;  %v521_v32 = vmul.f32 %v807_v18, %v1256_v13  ;;  %v522_v33 = vmul.f32 %v807_v18, %v1264_v21  ;;  %v523_v20 = vmul.f32 %v807_v18, %v1252_v9  ;;  %v544_v41 = vld [vmem:[%s1234_s20 + $0x20] sm:$0xff]  ;;  %v545_v42 = vld [vmem:[%s1234_s20 + $0x28] sm:$0xff]  ;;  %v546_v49 = vld [vmem:[%s1234_s20 + $0x30] sm:$0xff] }
 0x15a   : > { %v532_v34 = vadd.f32 %v808_v19, %v517_v23  ;;  %v534_v35 = vadd.f32 %v808_v19, %v519_v25  ;;  %v533_v12 = vadd.f32 %v808_v19, %v518_v26  ;;  %v535_v36 = vadd.f32 %v808_v19, %v520_v27  ;;  %v547_v50 = vld [vmem:[%s1234_s20 + $0x38] sm:$0xff] }
 0x15b   : > { %vm558_vm1 = vcmp.lt.s32.totalorder %v557_v28, 32  ;;  %v536_v8 = vadd.f32 %v808_v19, %v521_v32  ;;  %v537_v37 = vadd.f32 %v808_v19, %v522_v33  ;;  %v524_v13 = vmul.f32 %v807_v18, %v1260_v17 }
 0x15c   : > { %v548_v16 = vmul.f32 %v540_v24, %v532_v34  ;;  %v550_v38 = vmul.f32 %v542_v29, %v534_v35  ;;  %v549_v39 = vmul.f32 %v541_v30, %v533_v12  ;;  %v551_v40 = vmul.f32 %v543_v31, %v535_v36 }
 0x15d   : > { %v552_v44 = vmul.f32 %v544_v41, %v536_v8  ;;  %v538_v45 = vadd.f32 %v808_v19, %v523_v20  ;;  %v553_v47 = vmul.f32 %v545_v42, %v537_v37  ;;  %v539_v48 = vadd.f32 %v808_v19, %v524_v13 }
 0x15e   : > { %v559_v21 = vsel %vm558_vm1, %v548_v16, -1e+30  ;;  %v561_v43 = vsel %vm558_vm1, %v550_v38, -1e+30  ;;  %v560_v9 = vsel %vm558_vm1, %v549_v39, -1e+30 }
 0x15f   : > { %567 = vmax.xlane.f32.xlu0 %v559_v21  ;;  %571 = vmax.xlane.f32.xlu1 %v561_v43  ;;  %v562_v46 = vsel %vm558_vm1, %v551_v40, -1e+30  ;;  %v563_v17 = vsel %vm558_vm1, %v552_v44, -1e+30  ;;  %v564_v51 = vsel %vm558_vm1, %v553_v47, -1e+30  ;;  %v554_v52 = vmul.f32 %v546_v49, %v538_v45 }
 0x160   : > { %v555_v53 = vmul.f32 %v547_v50, %v539_v48 }
 0x161   : > { %v565_v54 = vsel %vm558_vm1, %v554_v52, -1e+30 }
 0x162   : > { %v566_v55 = vsel %vm558_vm1, %v555_v53, -1e+30 }
 0x163   : > { %569 = vmax.xlane.f32.xlu0 %v560_v9  ;;  %573 = vmax.xlane.f32.xlu1 %v562_v46 }
 0x167   : > { %575 = vmax.xlane.f32.xlu0 %v563_v17  ;;  %577 = vmax.xlane.f32.xlu1 %v564_v51 }
 0x16b   : > { %579 = vmax.xlane.f32.xlu0 %v565_v54  ;;  %581 = vmax.xlane.f32.xlu1 %v566_v55 }
 0x1e8   : > { %v568_v56 = vpop.xlane.xlu0 %567  ;;  %v572_v57 = vpop.xlane.xlu1 %571 }
 0x1e9   : > { %v583_v58 = vsub.f32 %v559_v21, %v568_v56  ;;  %v585_v59 = vsub.f32 %v561_v43, %v572_v57 }
 0x1eb   : > { %v591_v60 = vmul.f32 1.442695, %v583_v58  ;;  %v595_v61 = vmul.f32 1.442695, %v585_v59 }
 0x1ec   : > { %v570_v62 = vpop.xlane.xlu0 %569  ;;  %v574_v63 = vpop.xlane.xlu1 %573 }
 0x1ed   : > { %924 = vpow2.f32 %v591_v60  ;;  %v584_v0 = vsub.f32 %v560_v9, %v570_v62  ;;  %v586_v1 = vsub.f32 %v562_v46, %v574_v63 }
 0x1ee   : > { %926 = vpow2.f32 %v595_v61 }
 0x1ef   : > { %v593_v2 = vmul.f32 1.442695, %v584_v0  ;;  %v597_v3 = vmul.f32 1.442695, %v586_v1 }
 0x1f0   : > { %v576_v4 = vpop.xlane.xlu0 %575  ;;  %v578_v5 = vpop.xlane.xlu1 %577 }
 0x1f1   : > { %928 = vpow2.f32 %v593_v2  ;;  %v587_v6 = vsub.f32 %v563_v17, %v576_v4  ;;  %v588_v7 = vsub.f32 %v564_v51, %v578_v5 }
 0x1f2   : > { %930 = vpow2.f32 %v597_v3 }
 0x1f3   : > { %v599_v10 = vmul.f32 1.442695, %v587_v6  ;;  %v601_v11 = vmul.f32 1.442695, %v588_v7 }
 0x1f4   : > { %v580_v14 = vpop.xlane.xlu0 %579  ;;  %v582_v15 = vpop.xlane.xlu1 %581 }
 0x1f5   : > { %932 = vpow2.f32 %v599_v10  ;;  %v589_v18 = vsub.f32 %v565_v54, %v580_v14  ;;  %v590_v19 = vsub.f32 %v566_v55, %v582_v15 }
 0x1f6   : > { %934 = vpow2.f32 %v601_v11 }
 0x1f7   : > { %v603_v22 = vmul.f32 1.442695, %v589_v18  ;;  %v605_v23 = vmul.f32 1.442695, %v590_v19 }
 0x1f9   : > { %936 = vpow2.f32 %v603_v22 }
 0x1fa   : > { %v925_v24 = vpop.eup %924  ;;  %938 = vpow2.f32 %v605_v23 }
 0x1fb   : > { %607 = vadd.xlane.f32.xlu0 %v925_v24  ;;  %v927_v25 = vpop.eup %926 }
 0x1fe   : > { %v929_v26 = vpop.eup %928 }
 0x1ff   : > { %611 = vadd.xlane.f32.xlu0 %v927_v25  ;;  %609 = vadd.xlane.f32.xlu1 %v929_v26  ;;  %v931_v27 = vpop.eup %930 }
 0x202   : > { %v933_v28 = vpop.eup %932 }
 0x203   : > { %613 = vadd.xlane.f32.xlu1 %v931_v27  ;;  %615 = vadd.xlane.f32.xlu0 %v933_v28  ;;  %v935_v29 = vpop.eup %934 }
 0x206   : > { %v1336_v30 = vpop.eup %936 }
 0x207   : > { %617 = vadd.xlane.f32.xlu1 %v935_v29  ;;  %619 = vadd.xlane.f32.xlu0 %v1336_v30  ;;  %v1339_v31 = vpop.eup %938 }
 0x20b   : > { %621 = vadd.xlane.f32.xlu1 %v1339_v31 }
 0x284   : > { %v608_v32 = vpop.xlane.xlu0 %607 }
 0x285   : > { %940 = vrcp.f32 %v608_v32 }
 0x288   : > { %v610_v33 = vpop.xlane.xlu1 %609  ;;  %v612_v34 = vpop.xlane.xlu0 %611 }
 0x289   : > { %942 = vrcp.f32 %v610_v33 }
 0x28a   : > { %944 = vrcp.f32 %v612_v34 }
 0x28c   : > { %v614_v35 = vpop.xlane.xlu1 %613  ;;  %v616_v12 = vpop.xlane.xlu0 %615 }
 0x28d   : > { %946 = vrcp.f32 %v614_v35 }
 0x28e   : > { %948 = vrcp.f32 %v616_v12 }
 0x290   : > { %v618_v36 = vpop.xlane.xlu1 %617  ;;  %v620_v8 = vpop.xlane.xlu0 %619 }
 0x291   : > { %950 = vrcp.f32 %v618_v36 }
 0x292   : > { %v941_v37 = vpop.eup %940  ;;  %952 = vrcp.f32 %v620_v8 }
 0x293   : > { %v631_v20 = vmul.f32 %v941_v37, %v608_v32 }
 0x294   : > { %v622_v16 = vpop.xlane.xlu1 %621 }
 0x295   : > { %v639_v38 = vsub.f32 2.0, %v631_v20  ;;  %954 = vrcp.f32 %v622_v16 }
 0x296   : > { %v943_v39 = vpop.eup %942 }
 0x297   : > { %v945_v40 = vpop.eup %944  ;;  %v647_v41 = vmul.f32 %v941_v37, %v639_v38  ;;  %v632_v42 = vmul.f32 %v943_v39, %v610_v33 }
 0x298   : > { %v633_v13 = vmul.f32 %v945_v40, %v612_v34 }
 0x299   : > { %v655_v21 = vmul.f32 %v925_v24, %v647_v41  ;;  %v640_v43 = vsub.f32 2.0, %v632_v42 }
 0x29a   : > { %v947_v44 = vpop.eup %946  ;;  %v641_v45 = vsub.f32 2.0, %v633_v13 }
 0x29b   : > { %v949_v9 = vpop.eup %948  ;;  %663 = vst [vmem:[%s1268_s16] sm:$0xff] %v655_v21  ;;  %v648_v46 = vmul.f32 %v943_v39, %v640_v43  ;;  %v634_v47 = vmul.f32 %v947_v44, %v614_v35 }
 0x29c   : > { %v649_v48 = vmul.f32 %v945_v40, %v641_v45  ;;  %v635_v49 = vmul.f32 %v949_v9, %v616_v12 }
 0x29d   : > { %v656_v50 = vmul.f32 %v929_v26, %v648_v46  ;;  %v642_v17 = vsub.f32 2.0, %v634_v47 }
 0x29e   : > { %v951_v51 = vpop.eup %950  ;;  %v657_v52 = vmul.f32 %v927_v25, %v649_v48  ;;  %v643_v53 = vsub.f32 2.0, %v635_v49 }
 0x29f   : > { %v953_v54 = vpop.eup %952  ;;  %664 = vst [vmem:[%s1268_s16 + $0x8] sm:$0xff] %v656_v50  ;;  %v650_v55 = vmul.f32 %v947_v44, %v642_v17  ;;  %v636_v56 = vmul.f32 %v951_v51, %v618_v36 }
 0x2a0   : > { %665 = vst [vmem:[%s1268_s16 + $0x10] sm:$0xff] %v657_v52  ;;  %v651_v57 = vmul.f32 %v949_v9, %v643_v53  ;;  %v637_v58 = vmul.f32 %v953_v54, %v620_v8 }
 0x2a1   : > { %v658_v59 = vmul.f32 %v931_v27, %v650_v55  ;;  %v644_v60 = vsub.f32 2.0, %v636_v56 }
 0x2a2   : > { %v955_v61 = vpop.eup %954  ;;  %v659_v62 = vmul.f32 %v933_v28, %v651_v57  ;;  %v645_v63 = vsub.f32 2.0, %v637_v58 }
 0x2a3   : > { %666 = vst [vmem:[%s1268_s16 + $0x18] sm:$0xff] %v658_v59  ;;  %v652_v0 = vmul.f32 %v951_v51, %v644_v60  ;;  %v638_v1 = vmul.f32 %v955_v61, %v622_v16 }
 0x2a4   : > { %667 = vst [vmem:[%s1268_s16 + $0x20] sm:$0xff] %v659_v62  ;;  %v653_v2 = vmul.f32 %v953_v54, %v645_v63 }
 0x2a5   : > { %v660_v3 = vmul.f32 %v935_v29, %v652_v0  ;;  %v646_v4 = vsub.f32 2.0, %v638_v1 }
 0x2a6   : > { %v661_v5 = vmul.f32 %v1336_v30, %v653_v2 }
 0x2a7   : > { %668 = vst [vmem:[%s1268_s16 + $0x28] sm:$0xff] %v660_v3  ;;  %v654_v6 = vmul.f32 %v955_v61, %v646_v4 }
 0x2a8   : > { %669 = vst [vmem:[%s1268_s16 + $0x30] sm:$0xff] %v661_v5 }
 0x2a9   : > { %v662_v7 = vmul.f32 %v1339_v31, %v654_v6 }
 0x2ab   : > { %670 = vst [vmem:[%s1268_s16 + $0x38] sm:$0xff] %v662_v7 }
 0x2ac PF: > { %s815_s25 = sshll.u32 %s1064_s24, 10  ;;  %s685_s30 = sshll.u32 %s1268_s16, 4  ;;  %s1359_s30 = int_to_ptr.vmem [resolvable:$true] %s685_s30 }
 0x2ad   : > { %s1356_s29 = scalar_lea.hbm %s1418_s6, %s815_s25  ;;  %s672_s19 = scalar_lea.sflag [#allocation8], %s1228_s27 }
 0x2ae   : > { %s984_s17 = scalar_lea.vmem %s1359_s30, 1024  ;;  %s1087_s13 = smov [#allocation9]  }
 0x2af   : > { %p985_p6 = scmp.ne.s32.totalorder %s1359_s30, %s984_s17  ;;  %s988_s11 = sshll.u32 %s1087_s13, 4  ;;  %s989_s11 = int_to_ptr.vmem [resolvable:$false] %s988_s11 }
 0x2b0   : > { %s990_s24 = scalar_lea.vmem %s989_s11, 2048  ;;  %p991_p10 = scmp.lt.s32.totalorder %s1359_s30, %s989_s11 }
 0x2b1   : > { %p986_p7 = pnand %p985_p6, %p1199_p11  ;;  %p992_p3 = scmp.lt.s32.totalorder %s990_s24, %s984_s17 }
 0x2b3   : > { %p987_p9 = pneg %p986_p7  ;;  %p993_p12 = por %p992_p3, %p991_p10 }
 0x2b5   : > { %p994_p2 = pnand %p993_p12, %p987_p9 }
 0x2b7   : > { %997 = shalt.err (!%p994_p2)
}
 0x2b8   : > { %s998_s16 = scalar_lea.hbm %s1356_s29, 1024  ;;  %s1002_s8 = scalar_lea.hbm %s1418_s6, 4096 }
 0x2b9   : > { %p999_p0 = scmp.ne.s32.totalorder %s1356_s29, %s998_s16  ;;  %p1003_p4 = scmp.lt.s32.totalorder %s1356_s29, %s1418_s6 }
 0x2ba   : > { %p1004_p5 = scmp.lt.s32.totalorder %s1002_s8, %s998_s16 }
 0x2bb   : > { %p1000_p8 = pnand %p999_p0, %p1199_p11 }
 0x2bc   : > { %p1005_p6 = por %p1004_p5, %p1003_p4 }
 0x2bd   : > { %p1001_p1 = pneg %p1000_p8 }
 0x2bf   : > { %p1006_p7 = pnand %p1005_p6, %p1001_p1 }
 0x2c1   : > { %1009 = shalt.err (!%p1006_p7)
}
 0x2c2   : > { %s1088_s20 = smov 128   ;;  %s1089_s10 = smov 8  }
 0x2c3   : > { %835 = dma.vmem_to_hbm [thread:$0]  (%p1199_p11), %s1359_s30, 1024, %s1356_s29, %s672_s19, %s1088_s20, %s1088_s20, %s1089_s10  }
 0x2c4 PF: > { %p846_p9 = scmp.ge.s32.totalorder %s1080_s28, 2  ;;  %s700_s17 = sand.u32 1, %s1052_s21  }
 0x2c5   : > { %s701_s13 = scalar_lea.sflag [#allocation8], %s700_s17 }
 0x2c6   : > { %p842_p10 = pnand %p846_p9, %p1204_p13 }
 0x2c8   : > { %p843_p3 = pneg %p842_p10 }
 0x2ca   : > { %1047 = dma.done.wait (%p843_p3), %s701_s13, 1024  }
 0x2cb   : > { %1049 = vsyncadd (%p843_p3), %s701_s13, 4294966272  ;;  %s22_s28 = sadd.s32 1, %s1080_s28   ;;  %s1429_s25 = sld [smem:[#allocation12_spill]] }
 0x2cc   : > { %p19_p12 = scmp.ge.s32.totalorder %s22_s28, 10   ;;  %s1430_s14 = sld [smem:[#allocation13_spill]] }
 0x2cd   : > { %s1431_s27 = sld [smem:[#allocation14_spill]]  ;;  %s1432_s21 = smov %s1056_s22 }
 0x2ce   : > { %s1433_s22 = smov %s1060_s23  ;;  %s1434_s23 = smov %s1190_s12 }
 0x2cf   : > { %s1435_s24 = smov %s1072_s26  ;;  %21 = sbr.rel (!%p19_p12) target bundleno = 7 (0x7), region = 108 }
 0x2d2   : > { %s1436_s26 = smov %s1430_s14 }
 0x2d4   :  { %706 = vsyncpa [#allocation7], 1 }
 0x2d5   :  { %708 = vsyncpa [#allocation7 + $0x1], 1 }
 0x2d6   :  { %709 = vsyncpa [#allocation8], 1 }
 0x2d7   :  { %711 = vsyncpa [#allocation8 + $0x1], 1 }

</bundles_post_ra>
